<compile_context>
chip_gen: v6e
topology: v6e:2x2x1
jax: 0.10.0
libtpu: 0.0.40
codegen_flags: <defaults>
</compile_context>

<pallas_src>
import functools

import jax
import jax.numpy as jnp
from jax.experimental import pallas as pl
from jax.experimental.pallas import tpu as pltpu


def _round_up(n, m):
    return ((n + m - 1) // m) * m


def dueling_kernel(x_ref,
                   w_in_ref, b_in_ref,
                   w_h1_ref, b_h1_ref,
                   w_head_ref, b_head_ref,
                   out_ref, *, compute_dtype):
    x = x_ref[...].astype(compute_dtype)                               # [TB, In]

    # flat1 = relu(fc_in(x))
    h1 = jnp.dot(x, w_in_ref[...].astype(compute_dtype),
                 preferred_element_type=jnp.float32)
    h1 = jnp.maximum(h1 + b_in_ref[...], 0.0)                          # [TB, H1]

    # flat2 = relu(fc_h1(flat1))
    h2 = jnp.dot(h1.astype(compute_dtype), w_h1_ref[...].astype(compute_dtype),
                 preferred_element_type=jnp.float32)
    h2 = jnp.maximum(h2 + b_h1_ref[...], 0.0)                          # [TB, H2]

    # Fused V/A head: one matmul, one narrow (8-wide) store -> small HBM writeback.
    head = jnp.dot(h2.astype(compute_dtype), w_head_ref[...].astype(compute_dtype),
                   preferred_element_type=jnp.float32)
    out_ref[...] = (head + b_head_ref[...]).astype(out_ref.dtype)      # [TB, Hpad]


def prepare_params(params):
    """One-time parameter prep: fuse the V and A heads into a single weight/bias
    padded to a multiple of 8 columns.  Do NOT call this per forward pass."""
    w_in, b_in, w_h1, b_h1, w_v, b_v, w_a, b_a = params
    h2_size = w_h1.shape[1]
    out_size = w_a.shape[1]
    head_cols = 1 + out_size
    head_pad = _round_up(head_cols, 8)           # compact: 8 cols, not 128
    w_head = jnp.zeros((h2_size, head_pad), jnp.float32)
    w_head = w_head.at[:, :1].set(w_v).at[:, 1:head_cols].set(w_a)
    b_head = jnp.zeros((1, head_pad), jnp.float32)
    b_head = b_head.at[:, :1].set(b_v).at[:, 1:head_cols].set(b_a)
    return (w_in, b_in, w_h1, b_h1, w_head, b_head), out_size


def dueling_forward(x, fused_params, out_size, *, block_b=4096,
                    compute_dtype=jnp.float32):
    """Runs DuelingNN.forward. Returns (V, A) just like the PyTorch module."""
    w_in, b_in, w_h1, b_h1, w_head, b_head = fused_params
    B, in_size = x.shape
    h1_size = w_in.shape[1]
    h2_size = w_h1.shape[1]
    head_pad = w_head.shape[1]
    head_cols = 1 + out_size

    # ---- Batch tiling: multiple of 8 (f32 sublane), no wrapper-side padding.
    # Ensure >= 2 grid steps when possible so v7x's two TensorCores both work.
    b8 = _round_up(B, 8)
    if B >= 16:
        tb = min(block_b, _round_up(pl.cdiv(b8, 2), 8))
    else:
        tb = b8
    tb = max(8, (tb // 8) * 8)
    grid = (pl.cdiv(B, tb),)      # ragged last block is masked by Pallas

    # Weights/biases: full-array blocks with a constant index_map, so they are
    # DMA'd once and stay VMEM-resident across the batch grid.
    def const(arr):
        return pl.BlockSpec(arr.shape, lambda i, _nd=arr.ndim: (0,) * _nd)

    # ---- VMEM budget (with headroom), kept under v7x's 64 MiB physical VMEM.
    def lane_pad(n):
        return _round_up(max(n, 1), 128)
    per_step_bufs = tb * lane_pad(in_size) + tb * lane_pad(head_pad)   # x + out
    weights_vmem = (in_size * lane_pad(h1_size) + lane_pad(h1_size)
                    + h1_size * lane_pad(h2_size) + lane_pad(h2_size)
                    + h2_size * lane_pad(head_pad) + lane_pad(head_pad))
    intermediates = tb * (lane_pad(h1_size) + lane_pad(h2_size) + lane_pad(head_pad))
    vmem_est = 4 * (2 * per_step_bufs + 2 * weights_vmem + intermediates)
    vmem_limit = int(min(max(vmem_est * 3 // 2, 32 << 20), 48 << 20))

    flops = 2 * B * (in_size * h1_size + h1_size * h2_size + h2_size * head_pad)
    bytes_accessed = 4 * (B * in_size + B * head_pad
                          + in_size * h1_size + h1_size
                          + h1_size * h2_size + h2_size
                          + h2_size * head_pad + head_pad)

    kernel = functools.partial(dueling_kernel, compute_dtype=compute_dtype)

    # TODO(synk): if a profile shows exposed x DMA at very large B, bump the x
    # BlockSpec to pipeline_mode=pl.Buffered(3).
    out = pl.pallas_call(
        kernel,
        out_shape=jax.ShapeDtypeStruct((B, head_pad), jnp.float32),
        grid=grid,
        in_specs=[pl.BlockSpec((tb, in_size), lambda i: (i, 0)),
                  const(w_in), const(b_in),
                  const(w_h1), const(b_h1),
                  const(w_head), const(b_head)],
        out_specs=pl.BlockSpec((tb, head_pad), lambda i: (i, 0)),
        compiler_params=pltpu.CompilerParams(
            dimension_semantics=("parallel",),
            vmem_limit_bytes=vmem_limit),
        cost_estimate=pl.CostEstimate(flops=flops, transcendentals=0,
                                      bytes_accessed=bytes_accessed),
    )(x, w_in, b_in, w_h1, b_h1, w_head, b_head)

    # Wrapper-side split of the fused head output (free slices).
    V = out[:, :1]
    A = out[:, 1:head_cols]
    return V, A


def init_params(key, input_size, hidden1_size, hidden2_size, output_size):
    """Deterministic synthetic parameters (PyTorch-Linear-style uniform init),
    stored as [in, out] so the kernel computes x @ W + b."""
    def linear(k, fan_in, fan_out):
        k1, k2 = jax.random.split(k)
        bound = 1.0 / jnp.sqrt(fan_in)
        w = jax.random.uniform(k1, (fan_in, fan_out), jnp.float32, -bound, bound)
        b = jax.random.uniform(k2, (1, fan_out), jnp.float32, -bound, bound)
        return w, b

    k_in, k_h1, k_v, k_a = jax.random.split(key, 4)
    w_in, b_in = linear(k_in, input_size, hidden1_size)
    w_h1, b_h1 = linear(k_h1, hidden1_size, hidden2_size)
    w_v, b_v = linear(k_v, hidden2_size, 1)
    w_a, b_a = linear(k_a, hidden2_size, output_size)
    return (w_in, b_in, w_h1, b_h1, w_v, b_v, w_a, b_a)


if __name__ == "__main__":
    # Small shapes consistent with the module.
    batch = 8
    input_size = 16
    hidden1_size = 32
    hidden2_size = 32
    output_size = 4

    key = jax.random.PRNGKey(0)
    k_x, k_p = jax.random.split(key)

    x = jax.random.normal(k_x, (batch, input_size), jnp.float32)
    params = init_params(k_p, input_size, hidden1_size, hidden2_size, output_size)

    # One-time head fusion (hoisted out of the forward path).
    fused_params, out_size = prepare_params(params)

    V, A = dueling_forward(x, fused_params, out_size)
    jax.block_until_ready((V, A))

    # Reference check in plain JAX (same math as the PyTorch forward).
    w_in, b_in, w_h1, b_h1, w_v, b_v, w_a, b_a = params
    h1 = jnp.maximum(x @ w_in + b_in, 0.0)
    h2 = jnp.maximum(h1 @ w_h1 + b_h1, 0.0)
    V_ref = h2 @ w_v + b_v
    A_ref = h2 @ w_a + b_a
    assert V.shape == (batch, 1) and A.shape == (batch, output_size)
    assert jnp.allclose(V, V_ref, atol=1e-5) and jnp.allclose(A, A_ref, atol=1e-5)

    print("KERNEL_OK")
</pallas_src>

<mosaic_0001>
module attributes {stable_mosaic.version = 11 : i64} {
  func.func @dueling_kernel(%arg0: i32, %arg1: memref<8x16xf32, #tpu.memory_space<vmem>>, %arg2: memref<16x32xf32, #tpu.memory_space<vmem>>, %arg3: memref<1x32xf32, #tpu.memory_space<vmem>>, %arg4: memref<32x32xf32, #tpu.memory_space<vmem>>, %arg5: memref<1x32xf32, #tpu.memory_space<vmem>>, %arg6: memref<32x8xf32, #tpu.memory_space<vmem>>, %arg7: memref<1x8xf32, #tpu.memory_space<vmem>>, %arg8: memref<8x8xf32, #tpu.memory_space<vmem>>) attributes {dimension_semantics = [#tpu.dimension_semantics<parallel>], iteration_bounds = array<i64: 1>, scalar_prefetch = 0 : i64, scratch_operands = 0 : i64, tpu.core_type = #tpu.core_type<tc>, window_params = [{transform_indices = @transform_0, window_bounds = array<i64: 8, 16>}, {pipeline_mode = #tpu.pipeline_mode<synchronous>, transform_indices = @transform_1, window_bounds = array<i64: 16, 32>}, {pipeline_mode = #tpu.pipeline_mode<synchronous>, transform_indices = @transform_2, window_bounds = array<i64: 1, 32>}, {pipeline_mode = #tpu.pipeline_mode<synchronous>, transform_indices = @transform_3, window_bounds = array<i64: 32, 32>}, {pipeline_mode = #tpu.pipeline_mode<synchronous>, transform_indices = @transform_4, window_bounds = array<i64: 1, 32>}, {pipeline_mode = #tpu.pipeline_mode<synchronous>, transform_indices = @transform_5, window_bounds = array<i64: 32, 8>}, {pipeline_mode = #tpu.pipeline_mode<synchronous>, transform_indices = @transform_6, window_bounds = array<i64: 1, 8>}, {transform_indices = @transform_7, window_bounds = array<i64: 8, 8>}]} {
    %c0 = arith.constant 0 : index
    %c0_0 = arith.constant 0 : index
    %0 = vector.load %arg1[%c0, %c0_0] : memref<8x16xf32, #tpu.memory_space<vmem>>, vector<8x16xf32>
    %c0_1 = arith.constant 0 : index
    %c0_2 = arith.constant 0 : index
    %1 = vector.load %arg2[%c0_1, %c0_2] : memref<16x32xf32, #tpu.memory_space<vmem>>, vector<16x32xf32>
    %cst = arith.constant dense<0.000000e+00> : vector<8x32xf32>
    %2 = tpu.matmul %0, %1, %cst {dimension_numbers = #tpu.dot_dimension_numbers<[1], [0], [0], [1], [0, 0, 1, 1], [], []>} : vector<8x16xf32>, vector<16x32xf32>, vector<8x32xf32> -> vector<8x32xf32>
    %c0_3 = arith.constant 0 : index
    %c0_4 = arith.constant 0 : index
    %3 = vector.load %arg3[%c0_3, %c0_4] : memref<1x32xf32, #tpu.memory_space<vmem>>, vector<1x32xf32>
    %4 = vector.broadcast %3 : vector<1x32xf32> to vector<8x32xf32>
    %5 = arith.addf %2, %4 : vector<8x32xf32>
    %cst_5 = arith.constant 0.000000e+00 : f32
    %6 = vector.broadcast %cst_5 : f32 to vector<8x32xf32>
    %7 = arith.maximumf %5, %6 : vector<8x32xf32>
    %c0_6 = arith.constant 0 : index
    %c0_7 = arith.constant 0 : index
    %8 = vector.load %arg4[%c0_6, %c0_7] : memref<32x32xf32, #tpu.memory_space<vmem>>, vector<32x32xf32>
    %cst_8 = arith.constant dense<0.000000e+00> : vector<8x32xf32>
    %9 = tpu.matmul %7, %8, %cst_8 {dimension_numbers = #tpu.dot_dimension_numbers<[1], [0], [0], [1], [0, 0, 1, 1], [], []>} : vector<8x32xf32>, vector<32x32xf32>, vector<8x32xf32> -> vector<8x32xf32>
    %c0_9 = arith.constant 0 : index
    %c0_10 = arith.constant 0 : index
    %10 = vector.load %arg5[%c0_9, %c0_10] : memref<1x32xf32, #tpu.memory_space<vmem>>, vector<1x32xf32>
    %11 = vector.broadcast %10 : vector<1x32xf32> to vector<8x32xf32>
    %12 = arith.addf %9, %11 : vector<8x32xf32>
    %cst_11 = arith.constant 0.000000e+00 : f32
    %13 = vector.broadcast %cst_11 : f32 to vector<8x32xf32>
    %14 = arith.maximumf %12, %13 : vector<8x32xf32>
    %c0_12 = arith.constant 0 : index
    %c0_13 = arith.constant 0 : index
    %15 = vector.load %arg6[%c0_12, %c0_13] : memref<32x8xf32, #tpu.memory_space<vmem>>, vector<32x8xf32>
    %cst_14 = arith.constant dense<0.000000e+00> : vector<8x8xf32>
    %16 = tpu.matmul %14, %15, %cst_14 {dimension_numbers = #tpu.dot_dimension_numbers<[1], [0], [0], [1], [0, 0, 1, 1], [], []>} : vector<8x32xf32>, vector<32x8xf32>, vector<8x8xf32> -> vector<8x8xf32>
    %c0_15 = arith.constant 0 : index
    %c0_16 = arith.constant 0 : index
    %17 = vector.load %arg7[%c0_15, %c0_16] : memref<1x8xf32, #tpu.memory_space<vmem>>, vector<1x8xf32>
    %18 = vector.broadcast %17 : vector<1x8xf32> to vector<8x8xf32>
    %19 = arith.addf %16, %18 : vector<8x8xf32>
    %c0_17 = arith.constant 0 : index
    %c0_18 = arith.constant 0 : index
    %20 = vector.load %arg8[%c0_17, %c0_18] : memref<8x8xf32, #tpu.memory_space<vmem>>, vector<8x8xf32>
    tpu.vector_store %arg8[%c0_17, %c0_18], %19 {strides = array<i32>} : memref<8x8xf32, #tpu.memory_space<vmem>>, vector<8x8xf32>,
    return
  }
  func.func @transform_0(%arg0: i32) -> (i32, i32) {
    %c0_i32 = arith.constant 0 : i32
    %c0_i32_0 = arith.constant 0 : i32
    return %arg0, %c0_i32 : i32, i32
  }
  func.func @transform_1(%arg0: i32) -> (i32, i32) {
    %c0_i32 = arith.constant 0 : i32
    %c0_i32_0 = arith.constant 0 : i32
    %c0_i32_1 = arith.constant 0 : i32
    return %c0_i32, %c0_i32_0 : i32, i32
  }
  func.func @transform_2(%arg0: i32) -> (i32, i32) {
    %c0_i32 = arith.constant 0 : i32
    %c0_i32_0 = arith.constant 0 : i32
    %c0_i32_1 = arith.constant 0 : i32
    return %c0_i32, %c0_i32_0 : i32, i32
  }
  func.func @transform_3(%arg0: i32) -> (i32, i32) {
    %c0_i32 = arith.constant 0 : i32
    %c0_i32_0 = arith.constant 0 : i32
    %c0_i32_1 = arith.constant 0 : i32
    return %c0_i32, %c0_i32_0 : i32, i32
  }
  func.func @transform_4(%arg0: i32) -> (i32, i32) {
    %c0_i32 = arith.constant 0 : i32
    %c0_i32_0 = arith.constant 0 : i32
    %c0_i32_1 = arith.constant 0 : i32
    return %c0_i32, %c0_i32_0 : i32, i32
  }
  func.func @transform_5(%arg0: i32) -> (i32, i32) {
    %c0_i32 = arith.constant 0 : i32
    %c0_i32_0 = arith.constant 0 : i32
    %c0_i32_1 = arith.constant 0 : i32
    return %c0_i32, %c0_i32_0 : i32, i32
  }
  func.func @transform_6(%arg0: i32) -> (i32, i32) {
    %c0_i32 = arith.constant 0 : i32
    %c0_i32_0 = arith.constant 0 : i32
    %c0_i32_1 = arith.constant 0 : i32
    return %c0_i32, %c0_i32_0 : i32, i32
  }
  func.func @transform_7(%arg0: i32) -> (i32, i32) {
    %c0_i32 = arith.constant 0 : i32
    %c0_i32_0 = arith.constant 0 : i32
    return %arg0, %c0_i32 : i32, i32
  }
}

</mosaic_0001>

<bundles_post_ra>
// kernel: tpu_custom_call.1
= control target key start
LH: loop header
LB: loop body
LE: loop exit
PB: predicated region body
PF: predicated region fallthrough
CT: control target
= control target key end

     0   :  { %12 = vsyncpa [#allocation3], 0  ;;  %s541_s0 = inlined_call_operand.vmem [shape: f32[8,16], index: 0, kind: input, shape index: {}]   ;;  %s542_s1 = inlined_call_operand.hbm [shape: f32[16,32], index: 1, kind: input, shape index: {}]   ;;  %s543_s2 = inlined_call_operand.vmem [shape: f32[1,32], index: 2, kind: input, shape index: {}]   ;;  %s544_s3 = inlined_call_operand.vmem [shape: f32[32,32], index: 3, kind: input, shape index: {}]   ;;  %s545_s4 = inlined_call_operand.hbm [shape: f32[1,32], index: 4, kind: input, shape index: {}]   ;;  %s546_s5 = inlined_call_operand.vmem [shape: f32[32,8], index: 5, kind: input, shape index: {}]   ;;  %s547_s6 = inlined_call_operand.vmem [shape: f32[1,8], index: 6, kind: input, shape index: {}]   ;;  %s548_s7 = inlined_call_operand.hbm [shape: f32[8,8], index: 7, kind: output, shape index: {}]  }
   0x1   :  { %13 = vsyncpa [#allocation6], 0 }
   0x2   :  { %14 = vsyncpa [#allocation4], 0  ;;  %s447_s24 = smov [#allocation2]  }
   0x3   :  { %s22_s25 = sshll.u32 %s447_s24, 4  ;;  %s23_s25 = int_to_ptr.vmem [resolvable:$true] %s22_s25 }
   0x4   :  { %s389_s26 = scalar_lea.vmem %s23_s25, 256  ;;  %p394_p1 = scmp.lt.s32.totalorder %s23_s25, %s23_s25 }
   0x5   :  { %p390_p0 = scmp.ne.s32.totalorder %s23_s25, %s389_s26  ;;  %p395_p2 = scmp.lt.s32.totalorder %s389_s26, %s389_s26 }
   0x7   :  { %p396_p3 = por %p395_p2, %p394_p1 }
   0x9   :  { %p397_p4 = pnand %p396_p3, %p390_p0 }
   0xb   :  { %400 = shalt.err (!%p397_p4)
}
   0xc   :  { %s448_s27 = smov 128   ;;  %s449_s28 = smov 8  }
   0xd   :  { %28 = dma.hbm_to_vmem [thread:$0]  %s542_s1, 256, %s23_s25, [#allocation3], %s448_s27, %s448_s27, %s449_s28  }
   0xe   :  { %s450_s8 = smov [#allocation5]  }
   0xf   :  { %s39_s9 = sshll.u32 %s450_s8, 4  ;;  %s40_s9 = int_to_ptr.vmem [resolvable:$true] %s39_s9 }
  0x10   :  { %s409_s10 = scalar_lea.vmem %s40_s9, 16  ;;  %s413_s11 = scalar_lea.vmem %s40_s9, 32 }
  0x11   :  { %p410_p5 = scmp.ne.s32.totalorder %s40_s9, %s409_s10  ;;  %p414_p6 = scmp.lt.s32.totalorder %s40_s9, %s40_s9 }
  0x12   :  { %p415_p7 = scmp.lt.s32.totalorder %s413_s11, %s409_s10 }
  0x14   :  { %p416_p8 = por %p415_p7, %p414_p6 }
  0x16   :  { %p417_p9 = pnand %p416_p8, %p410_p5 }
  0x18   :  { %420 = shalt.err (!%p417_p9)
}
  0x19   :  { %42 = dma.hbm_to_vmem [thread:$0]  %s545_s4, 16, %s40_s9, [#allocation6]  }
  0x1a   :  { %441 = dma.done.wait [#allocation3], 256  }
  0x1b   :  { %442 = vsyncadd [#allocation3], 4294967040 }
  0x1c   :  { %443 = dma.done.wait [#allocation6], 16  }
  0x1d   :  { %444 = vsyncadd [#allocation6], 4294967280  ;;  %v451_v0 = vmov 0.0   ;;  %vm452_vm0 = vmmov 0   ;;  %v55_v1 = vld [vmem:[#allocation2 + $0x8] sm:$0xff]  ;;  %v54_v2 = vld [vmem:[#allocation2] sm:$0xff] }
  0x1e   :  { %345 = vmatprep.subr.mxu0 %v451_v0  ;;  %349 = vmatprep.mubr.msk.f32.mxu0 %vm452_vm0, %v451_v0  ;;  %v53_v3 = vld [vmem:[%s541_s0] sm:$0xff]  ;;  %vm63_vm1 = vcmask 130048   ;;  %v141_v4 = vld [vmem:[%s544_s3 + $0x18] sm:$0xff]  ;;  %v140_v5 = vld [vmem:[%s544_s3 + $0x10] sm:$0xff]  ;;  %vm149_vm2 = vcmask 261120   ;;  %s453_s8 = smov [#allocation7]  }
  0x1f   :  { %352 = vmatprep.subr.mxu1 %v451_v0  ;;  %360 = vmatprep.mubr.msk.f32.mxu1 %vm452_vm0, %v451_v0  ;;  %v139_v6 = vld [vmem:[%s544_s3 + $0x8] sm:$0xff]  ;;  %v138_v7 = vld [vmem:[%s544_s3] sm:$0xff]  ;;  %v227_v8 = vld [vmem:[%s546_s5 + $0x18] sm:$0xff]  ;;  %s316_s9 = sshll.u32 %s453_s8, 4  ;;  %vm308_vm3 = vcmask 64512   ;;  %s317_s9 = int_to_ptr.vmem [resolvable:$true] %s316_s9 }
  0x20   :  { %346 = vmatpush3.msra.mxu0 %v55_v1  ;;  %353 = vmatpush3.msra.mxu1 %v141_v4  ;;  %v326_v9 = vld [vmem:[%s543_s2] ss:$0 sm:$0xff]  ;;  %v226_v14 = vld [vmem:[%s546_s5 + $0x10] sm:$0xff]  ;;  %v225_v15 = vld [vmem:[%s546_s5 + $0x8] sm:$0xff]  ;;  %p426_p11 = scmp.lt.s32.totalorder %s317_s9, %s317_s9 }
  0x21   :  { %347 = vmatprep.subr.mxu0 %v451_v0  ;;  %354 = vmatprep.subr.mxu1 %v451_v0  ;;  %v224_v16 = vld [vmem:[%s546_s5] sm:$0xff]  ;;  %v328_v17 = vld [vmem:[#allocation5] ss:$0 sm:$0xff]  ;;  %s421_s5 = scalar_lea.vmem %s317_s9, 128 }
  0x22   :  { %348 = vmatpush3.msra.mxu0 %v54_v2  ;;  %355 = vmatpush3.msra.mxu1 %v140_v5  ;;  %v330_v22 = vld [vmem:[%s547_s6] ss:$0 sm:$0xff]  ;;  %p422_p10 = scmp.ne.s32.totalorder %s317_s9, %s421_s5  ;;  %p427_p12 = scmp.lt.s32.totalorder %s421_s5, %s421_s5 }
  0x23   :  { %350 = vmatmul.mubr.msk.f32.vlgmr.msra.gmra.mxu0 %vm63_vm1, %v53_v3  ;;  %363 = vmatprep.subr.mxu0 %v451_v0 }
  0x24   :  { %371 = vmatprep.mubr.msk.f32.mxu0 %vm452_vm0, %v451_v0  ;;  %356 = vmatprep.subr.mxu1 %v451_v0  ;;  %p428_p13 = por %p427_p12, %p426_p11 }
  0x25   :  { %357 = vmatpush3.msra.mxu1 %v139_v6  ;;  %364 = vmatpush3.msra.mxu0 %v227_v8 }
  0x26   :  { %358 = vmatprep.subr.mxu1 %v451_v0  ;;  %365 = vmatprep.subr.mxu0 %v451_v0  ;;  %p429_p0 = pnand %p428_p13, %p422_p10 }
  0x27   :  { %359 = vmatpush3.msra.mxu1 %v138_v7  ;;  %366 = vmatpush3.msra.mxu0 %v226_v14 }
  0x28   :  { %367 = vmatprep.subr.mxu0 %v451_v0 }
  0x29   :  { %368 = vmatpush3.msra.mxu0 %v225_v15 }
  0x2a   :  { %369 = vmatprep.subr.mxu0 %v451_v0 }
  0x2b   :  { %370 = vmatpush3.msra.mxu0 %v224_v16 }
  0xe3   :  { %v133_v10 = vpop.f32.mrf.mxu0 }
  0xe4   :  { %v134_v11 = vadd.f32 %v326_v9, %v133_v10 }
  0xe5   :  { %v351_v12 = vpop.f32.mrf.mxu0 }
  0xe6   :  { %v137_v13 = vmax.f32 %v134_v11, 0.0 }
  0xe8   :  { %361 = vmatmul.mubr.msk.f32.vlgmr.msra.gmra.mxu1 %vm149_vm2, %v137_v13 }
 0x1a8   :  { %v219_v18 = vpop.f32.mrf.mxu1 }
 0x1a9   :  { %v220_v19 = vadd.f32 %v328_v17, %v219_v18 }
 0x1aa   :  { %v362_v20 = vpop.f32.mrf.mxu1 }
 0x1ab   :  { %v223_v21 = vmax.f32 %v220_v19, 0.0 }
 0x1ad   :  { %372 = vmatmul.mubr.msk.f32.vlgmr.msra.gmra.mxu0 %vm149_vm2, %v223_v21 }
 0x26d   :  { %v304_v23 = vpop.f32.mrf.mxu0 }
 0x26e   :  { %v305_v24 = vadd.f32 %v330_v22, %v304_v23 }
 0x26f   :  { %v373_v25 = vpop.f32.mrf.mxu0 }
 0x270   :  { %309 = vst.msk [vmem:[#allocation7] sm:$0xff] %vm308_vm3, %v305_v24 }
 0x271   :  { %432 = shalt.err (!%p429_p0)
}
 0x272   :  { %319 = dma.vmem_to_hbm [thread:$0]  %s317_s9, 128, %s548_s7, [#allocation4]  }
 0x273   :  { %445 = dma.done.wait [#allocation4], 128  }
 0x274   :  { %446 = vsyncadd [#allocation4], 4294967168 }
 0x275   :  { %323 = vsyncpa [#allocation3], 1 }
 0x276   :  { %324 = vsyncpa [#allocation6], 1 }
 0x277   :  { %325 = vsyncpa [#allocation4], 1 }

</bundles_post_ra>
